<compile_context>
chip_gen: v7x
topology: tpu7x:2x2x1
jax: 0.10.0
libtpu: 0.0.40
codegen_flags: <defaults>
</compile_context>

<pallas_src>
import math
import jax
import jax.numpy as jnp
from jax import lax
from jax.experimental import pallas as pl
from jax.experimental.pallas import tpu as pltpu

# ---------------- problem sizes (small, consistent with the module) ----------------
B = 2              # batch
S = 8              # sequence length (tokens)
D = 32             # d_model
H = 4              # num_heads
DH = D // H        # head dim = 8
MLP_H = int(D * 4.0)   # mlp hidden dim = 128
N = B * S          # fused row count = 16
EPS = 1e-5


def _gelu_exact(z):
    # PyTorch nn.GELU() default = exact (erf) formulation
    return 0.5 * z * (1.0 + lax.erf(z / jnp.sqrt(jnp.float32(2.0))))


def _layernorm(v, g, b):
    mu = jnp.mean(v, axis=-1, keepdims=True)
    var = jnp.mean((v - mu) ** 2, axis=-1, keepdims=True)
    return (v - mu) * lax.rsqrt(var + EPS) * g + b


# ---------------------------------- Pallas kernel ----------------------------------
def vit_block_kernel(x_ref,        # (N, D)        fused (batch*seq, d_model)
                     pvec_ref,     # (8, 128)      all 1-D params packed (one vreg)
                     wqkv_ref,     # (D, 3D)       in_proj^T, Q columns pre-scaled
                     wo_ref,       # (D, D)        out_proj^T (full, single matmul)
                     w1_ref,       # (D, MLP_H)
                     w2_ref,       # (MLP_H, D)
                     o_ref):       # (N, D)
    x = x_ref[...]                                  # (N, D)
    pv = pvec_ref[...]                              # (8, 128)

    g1   = pv[0:1, :D]
    be1  = pv[1:2, :D]
    bqkv = pv[2:3, :3 * D]
    bo   = pv[3:4, :D]
    g2   = pv[4:5, :D]
    be2  = pv[5:6, :D]
    b1   = pv[6:7, :MLP_H]
    b2   = pv[7:8, :D]

    # ---- attention branch ----
    h = _layernorm(x, g1, be1)                                               # norm1(x)
    qkv = jnp.dot(h, wqkv_ref[...], preferred_element_type=jnp.float32) + bqkv  # (N, 3D)
    qkv3 = qkv.reshape(B, S, 3 * D)        # cheap: last dim unchanged, sublane split

    # Head-batched q/k/v: (B*H, S, DH), batch index = h*B + b.
    # Built from static lane slices + a leading-axis concat (no risky 4-D transpose).
    q_bh = jnp.concatenate(
        [qkv3[:, :,           hh * DH:          (hh + 1) * DH] for hh in range(H)], axis=0)
    k_bh = jnp.concatenate(
        [qkv3[:, :,     D +   hh * DH:      D + (hh + 1) * DH] for hh in range(H)], axis=0)
    v_bh = jnp.concatenate(
        [qkv3[:, :, 2 * D +   hh * DH:  2 * D + (hh + 1) * DH] for hh in range(H)], axis=0)

    # Single batched score matmul (scale already folded into Q weights/bias),
    # softmax reduces run ONCE over all (B, H) pairs.
    s = jnp.einsum('bqd,bkd->bqk', q_bh, k_bh,
                   preferred_element_type=jnp.float32)                      # (B*H, S, S)
    s = s - jnp.max(s, axis=-1, keepdims=True)
    p = jnp.exp(s)
    p = p / jnp.sum(p, axis=-1, keepdims=True)       # exact divide (strict parity)
    ctx_bh = jnp.einsum('bqk,bkd->bqd', p, v_bh,
                        preferred_element_type=jnp.float32)                 # (B*H, S, DH)

    # Re-interleave heads along lanes -> (N, D), then ONE full out-projection matmul.
    ctx = jnp.concatenate([ctx_bh[hh * B:(hh + 1) * B] for hh in range(H)], axis=-1)  # (B,S,D)
    ctx = ctx.reshape(N, D)
    attn = jnp.dot(ctx, wo_ref[...], preferred_element_type=jnp.float32) + bo
    # TODO(synk): attention dropout omitted (inference semantics).
    x1 = x + attn

    # ---- MLP branch ----
    h2 = _layernorm(x1, g2, be2)                                             # norm2
    m = jnp.dot(h2, w1_ref[...], preferred_element_type=jnp.float32) + b1
    m = _gelu_exact(m)
    m = jnp.dot(m, w2_ref[...], preferred_element_type=jnp.float32) + b2
    # TODO(synk): MLP dropout omitted (inference semantics).
    o_ref[...] = x1 + m


# ----------------------------------- wrapper ----------------------------------------
def _pack_vectors(g1, be1, bqkv, bo, g2, be2, b1, b2):
    """Pack all small 1-D parameters into a single (8, 128) f32 array (one vreg)."""
    pv = jnp.zeros((8, 128), jnp.float32)
    pv = pv.at[0, :D].set(g1)
    pv = pv.at[1, :D].set(be1)
    pv = pv.at[2, :3 * D].set(bqkv)
    pv = pv.at[3, :D].set(bo)
    pv = pv.at[4, :D].set(g2)
    pv = pv.at[5, :D].set(be2)
    pv = pv.at[6, :MLP_H].set(b1)
    pv = pv.at[7, :D].set(b2)
    return pv


def vit_block_pallas(x, torch_params):
    """x: (B, S, D). torch_params use PyTorch layouts (Linear weight = (out, in))."""
    (ln1_g, ln1_b, in_proj_w, in_proj_b, out_proj_w, out_proj_b,
     ln2_g, ln2_b, fc1_w, fc1_b, fc2_w, fc2_b) = torch_params

    scale = 1.0 / math.sqrt(DH)
    # Pre-transpose for right-multiply; fold softmax scale into Q weights/bias.
    wqkv_t = in_proj_w.T                                  # (D, 3D)
    wqkv_t = wqkv_t.at[:, :D].multiply(scale)
    bqkv = in_proj_b.at[:D].multiply(scale)               # (3D,)
    wo_t = out_proj_w.T                                   # (D, D)
    w1_t = fc1_w.T                                        # (D, MLP_H)
    w2_t = fc2_w.T                                        # (MLP_H, D)

    pvec = _pack_vectors(ln1_g, ln1_b, bqkv, out_proj_b, ln2_g, ln2_b, fc1_b, fc2_b)

    x2 = x.reshape(N, D)                                  # fuse batch into rows

    y2 = pl.pallas_call(
        vit_block_kernel,
        out_shape=jax.ShapeDtypeStruct((N, D), jnp.float32),
        grid=(1,),                                        # single fused step
        in_specs=[
            pl.BlockSpec((N, D),        lambda i: (0, 0)),
            pl.BlockSpec((8, 128),      lambda i: (0, 0)),
            pl.BlockSpec((D, 3 * D),    lambda i: (0, 0)),
            pl.BlockSpec((D, D),        lambda i: (0, 0)),
            pl.BlockSpec((D, MLP_H),    lambda i: (0, 0)),
            pl.BlockSpec((MLP_H, D),    lambda i: (0, 0)),
        ],
        out_specs=pl.BlockSpec((N, D), lambda i: (0, 0)),
        # For real ViT sizes: add a leading "parallel" token/batch grid axis (v7x
        # 2 TCs), fuse L layers via grid=(L,) with per-layer weight index_maps,
        # cast matmul operands to bf16, and re-derive MLP tiles for v7x's 64 MiB
        # VMEM.  At this toy size a single step on one core is fastest.
        compiler_params=pltpu.CompilerParams(dimension_semantics=("arbitrary",)),
    )(x2, pvec, wqkv_t, wo_t, w1_t, w2_t)

    return y2.reshape(B, S, D)


# ------------------------------ pure-JAX reference ---------------------------------
def vit_block_ref(x, torch_params):
    (ln1_g, ln1_b, in_proj_w, in_proj_b, out_proj_w, out_proj_b,
     ln2_g, ln2_b, fc1_w, fc1_b, fc2_w, fc2_b) = torch_params

    h = _layernorm(x, ln1_g, ln1_b)                               # (B, S, D)
    qkv = h @ in_proj_w.T + in_proj_b                             # (B, S, 3D)
    q, k, v = qkv[..., :D], qkv[..., D:2 * D], qkv[..., 2 * D:]

    def split(t):                                                 # (B, H, S, DH)
        return t.reshape(B, S, H, DH).transpose(0, 2, 1, 3)

    qh, kh, vh = split(q), split(k), split(v)
    s = jnp.einsum('bhqd,bhkd->bhqk', qh, kh) / math.sqrt(DH)
    p = jax.nn.softmax(s, axis=-1)
    ctx = jnp.einsum('bhqk,bhkd->bhqd', p, vh)
    ctx = ctx.transpose(0, 2, 1, 3).reshape(B, S, D)
    attn = ctx @ out_proj_w.T + out_proj_b
    x1 = x + attn

    h2 = _layernorm(x1, ln2_g, ln2_b)
    m = _gelu_exact(h2 @ fc1_w.T + fc1_b) @ fc2_w.T + fc2_b
    return x1 + m


# ------------------------------------ main ------------------------------------------
if __name__ == "__main__":
    key = jax.random.PRNGKey(0)
    ks = jax.random.split(key, 12)

    x = jax.random.normal(ks[0], (B, S, D), dtype=jnp.float32)

    # Parameters in PyTorch layouts (Linear weight = (out_features, in_features)).
    ln1_g = 1.0 + 0.1 * jax.random.normal(ks[8], (D,), jnp.float32)
    ln1_b = 0.1 * jax.random.normal(ks[9], (D,), jnp.float32)
    ln2_g = 1.0 + 0.1 * jax.random.normal(ks[10], (D,), jnp.float32)
    ln2_b = 0.1 * jax.random.normal(ks[11], (D,), jnp.float32)

    in_proj_w = 0.05 * jax.random.normal(ks[1], (3 * D, D), jnp.float32)
    in_proj_b = 0.05 * jax.random.normal(ks[2], (3 * D,), jnp.float32)
    out_proj_w = 0.05 * jax.random.normal(ks[3], (D, D), jnp.float32)
    out_proj_b = 0.05 * jax.random.normal(ks[4], (D,), jnp.float32)
    fc1_w = 0.05 * jax.random.normal(ks[5], (MLP_H, D), jnp.float32)
    fc1_b = 0.05 * jax.random.normal(ks[6], (MLP_H,), jnp.float32)
    fc2_w = 0.05 * jax.random.normal(ks[7], (D, MLP_H), jnp.float32)
    fc2_b = jnp.zeros((D,), jnp.float32)

    torch_params = (ln1_g, ln1_b, in_proj_w, in_proj_b, out_proj_w, out_proj_b,
                    ln2_g, ln2_b, fc1_w, fc1_b, fc2_w, fc2_b)

    y = vit_block_pallas(x, torch_params)
    jax.block_until_ready(y)

    y_ref = vit_block_ref(x, torch_params)
    # Approx reciprocal removed -> kernel softmax is exact.  Residual tolerance
    # covers the folded 1/sqrt(DH) rounding order and XLA's default matmul
    # precision in the reference path.
    assert jnp.allclose(y, y_ref, atol=1e-3, rtol=1e-3), "mismatch vs JAX reference"

    print("KERNEL_OK")
</pallas_src>

<mosaic_0001>
module attributes {stable_mosaic.version = 11 : i64} {
  func.func @vit_block_kernel(%arg0: i32, %arg1: memref<16x32xf32, #tpu.memory_space<vmem>>, %arg2: memref<8x128xf32, #tpu.memory_space<vmem>>, %arg3: memref<32x96xf32, #tpu.memory_space<vmem>>, %arg4: memref<32x32xf32, #tpu.memory_space<vmem>>, %arg5: memref<32x128xf32, #tpu.memory_space<vmem>>, %arg6: memref<128x32xf32, #tpu.memory_space<vmem>>, %arg7: memref<16x32xf32, #tpu.memory_space<vmem>>) attributes {dimension_semantics = [#tpu.dimension_semantics<arbitrary>], iteration_bounds = array<i64: 1>, scalar_prefetch = 0 : i64, scratch_operands = 0 : i64, tpu.core_type = #tpu.core_type<tc>, window_params = [{pipeline_mode = #tpu.pipeline_mode<synchronous>, transform_indices = @transform_0, window_bounds = array<i64: 16, 32>}, {pipeline_mode = #tpu.pipeline_mode<synchronous>, transform_indices = @transform_1, window_bounds = array<i64: 8, 128>}, {pipeline_mode = #tpu.pipeline_mode<synchronous>, transform_indices = @transform_2, window_bounds = array<i64: 32, 96>}, {pipeline_mode = #tpu.pipeline_mode<synchronous>, transform_indices = @transform_3, window_bounds = array<i64: 32, 32>}, {pipeline_mode = #tpu.pipeline_mode<synchronous>, transform_indices = @transform_4, window_bounds = array<i64: 32, 128>}, {pipeline_mode = #tpu.pipeline_mode<synchronous>, transform_indices = @transform_5, window_bounds = array<i64: 128, 32>}, {pipeline_mode = #tpu.pipeline_mode<synchronous>, transform_indices = @transform_6, window_bounds = array<i64: 16, 32>}]} {
    %c0 = arith.constant 0 : index
    %c0_0 = arith.constant 0 : index
    %0 = vector.load %arg1[%c0, %c0_0] : memref<16x32xf32, #tpu.memory_space<vmem>>, vector<16x32xf32>
    %c0_1 = arith.constant 0 : index
    %c0_2 = arith.constant 0 : index
    %1 = vector.load %arg2[%c0_1, %c0_2] : memref<8x128xf32, #tpu.memory_space<vmem>>, vector<8x128xf32>
    %2 = vector.extract_strided_slice %1 {offsets = [0, 0], sizes = [1, 32], strides = [1, 1]} : vector<8x128xf32> to vector<1x32xf32>
    %3 = vector.extract_strided_slice %1 {offsets = [1, 0], sizes = [1, 32], strides = [1, 1]} : vector<8x128xf32> to vector<1x32xf32>
    %4 = vector.extract_strided_slice %1 {offsets = [2, 0], sizes = [1, 96], strides = [1, 1]} : vector<8x128xf32> to vector<1x96xf32>
    %5 = vector.extract_strided_slice %1 {offsets = [3, 0], sizes = [1, 32], strides = [1, 1]} : vector<8x128xf32> to vector<1x32xf32>
    %6 = vector.extract_strided_slice %1 {offsets = [4, 0], sizes = [1, 32], strides = [1, 1]} : vector<8x128xf32> to vector<1x32xf32>
    %7 = vector.extract_strided_slice %1 {offsets = [5, 0], sizes = [1, 32], strides = [1, 1]} : vector<8x128xf32> to vector<1x32xf32>
    %8 = vector.extract_strided_slice %1 {offsets = [6, 0], sizes = [1, 128], strides = [1, 1]} : vector<8x128xf32> to vector<1x128xf32>
    %9 = vector.extract_strided_slice %1 {offsets = [7, 0], sizes = [1, 32], strides = [1, 1]} : vector<8x128xf32> to vector<1x32xf32>
    %cst = arith.constant dense<0.000000e+00> : vector<16xf32>
    %10 = vector.multi_reduction <add>, %0, %cst [1] : vector<16x32xf32> to vector<16xf32>
    %11 = vector.shape_cast %10 : vector<16xf32> to vector<16x1xf32>
    %cst_3 = arith.constant 3.200000e+01 : f32
    %12 = vector.broadcast %cst_3 : f32 to vector<16x1xf32>
    %13 = arith.divf %11, %12 : vector<16x1xf32>
    %14 = vector.broadcast %13 : vector<16x1xf32> to vector<16x32xf32>
    %15 = arith.subf %0, %14 : vector<16x32xf32>
    %16 = arith.mulf %15, %15 : vector<16x32xf32>
    %cst_4 = arith.constant dense<0.000000e+00> : vector<16xf32>
    %17 = vector.multi_reduction <add>, %16, %cst_4 [1] : vector<16x32xf32> to vector<16xf32>
    %18 = vector.shape_cast %17 : vector<16xf32> to vector<16x1xf32>
    %cst_5 = arith.constant 3.200000e+01 : f32
    %19 = vector.broadcast %cst_5 : f32 to vector<16x1xf32>
    %20 = arith.divf %18, %19 : vector<16x1xf32>
    %21 = vector.broadcast %13 : vector<16x1xf32> to vector<16x32xf32>
    %22 = arith.subf %0, %21 : vector<16x32xf32>
    %cst_6 = arith.constant 9.99999974E-6 : f32
    %23 = vector.broadcast %cst_6 : f32 to vector<16x1xf32>
    %24 = arith.addf %20, %23 : vector<16x1xf32>
    %25 = math.rsqrt %24 : vector<16x1xf32>
    %26 = vector.broadcast %25 : vector<16x1xf32> to vector<16x32xf32>
    %27 = arith.mulf %22, %26 : vector<16x32xf32>
    %28 = vector.broadcast %2 : vector<1x32xf32> to vector<16x32xf32>
    %29 = arith.mulf %27, %28 : vector<16x32xf32>
    %30 = vector.broadcast %3 : vector<1x32xf32> to vector<16x32xf32>
    %31 = arith.addf %29, %30 : vector<16x32xf32>
    %c0_7 = arith.constant 0 : index
    %c0_8 = arith.constant 0 : index
    %32 = vector.load %arg3[%c0_7, %c0_8] : memref<32x96xf32, #tpu.memory_space<vmem>>, vector<32x96xf32>
    %cst_9 = arith.constant dense<0.000000e+00> : vector<16x96xf32>
    %33 = tpu.matmul %31, %32, %cst_9 {dimension_numbers = #tpu.dot_dimension_numbers<[1], [0], [0], [1], [0, 0, 1, 1], [], []>} : vector<16x32xf32>, vector<32x96xf32>, vector<16x96xf32> -> vector<16x96xf32>
    %34 = vector.broadcast %4 : vector<1x96xf32> to vector<16x96xf32>
    %35 = arith.addf %33, %34 : vector<16x96xf32>
    %36 = vector.shape_cast %35 : vector<16x96xf32> to vector<2x8x96xf32>
    %37 = vector.extract_strided_slice %36 {offsets = [0, 0, 0], sizes = [2, 8, 8], strides = [1, 1, 1]} : vector<2x8x96xf32> to vector<2x8x8xf32>
    %38 = vector.extract_strided_slice %36 {offsets = [0, 0, 8], sizes = [2, 8, 8], strides = [1, 1, 1]} : vector<2x8x96xf32> to vector<2x8x8xf32>
    %39 = vector.extract_strided_slice %36 {offsets = [0, 0, 16], sizes = [2, 8, 8], strides = [1, 1, 1]} : vector<2x8x96xf32> to vector<2x8x8xf32>
    %40 = vector.extract_strided_slice %36 {offsets = [0, 0, 24], sizes = [2, 8, 8], strides = [1, 1, 1]} : vector<2x8x96xf32> to vector<2x8x8xf32>
    %41 = tpu.concatenate %37, %38, %39, %40 in 0 : vector<2x8x8xf32>, vector<2x8x8xf32>, vector<2x8x8xf32>, vector<2x8x8xf32> -> vector<8x8x8xf32>
    %42 = vector.extract_strided_slice %36 {offsets = [0, 0, 32], sizes = [2, 8, 8], strides = [1, 1, 1]} : vector<2x8x96xf32> to vector<2x8x8xf32>
    %43 = vector.extract_strided_slice %36 {offsets = [0, 0, 40], sizes = [2, 8, 8], strides = [1, 1, 1]} : vector<2x8x96xf32> to vector<2x8x8xf32>
    %44 = vector.extract_strided_slice %36 {offsets = [0, 0, 48], sizes = [2, 8, 8], strides = [1, 1, 1]} : vector<2x8x96xf32> to vector<2x8x8xf32>
    %45 = vector.extract_strided_slice %36 {offsets = [0, 0, 56], sizes = [2, 8, 8], strides = [1, 1, 1]} : vector<2x8x96xf32> to vector<2x8x8xf32>
    %46 = tpu.concatenate %42, %43, %44, %45 in 0 : vector<2x8x8xf32>, vector<2x8x8xf32>, vector<2x8x8xf32>, vector<2x8x8xf32> -> vector<8x8x8xf32>
    %47 = vector.extract_strided_slice %36 {offsets = [0, 0, 64], sizes = [2, 8, 8], strides = [1, 1, 1]} : vector<2x8x96xf32> to vector<2x8x8xf32>
    %48 = vector.extract_strided_slice %36 {offsets = [0, 0, 72], sizes = [2, 8, 8], strides = [1, 1, 1]} : vector<2x8x96xf32> to vector<2x8x8xf32>
    %49 = vector.extract_strided_slice %36 {offsets = [0, 0, 80], sizes = [2, 8, 8], strides = [1, 1, 1]} : vector<2x8x96xf32> to vector<2x8x8xf32>
    %50 = vector.extract_strided_slice %36 {offsets = [0, 0, 88], sizes = [2, 8, 8], strides = [1, 1, 1]} : vector<2x8x96xf32> to vector<2x8x8xf32>
    %51 = tpu.concatenate %47, %48, %49, %50 in 0 : vector<2x8x8xf32>, vector<2x8x8xf32>, vector<2x8x8xf32>, vector<2x8x8xf32> -> vector<8x8x8xf32>
    "tpu.trace_start"() <{level = 10 : i32, message = "bqd,bkd->bqk"}> : () -> ()
    %cst_10 = arith.constant dense<0.000000e+00> : vector<8x8x8xf32>
    %52 = tpu.matmul %41, %46, %cst_10 {dimension_numbers = #tpu.dot_dimension_numbers<[2], [2], [1], [1], [0, 0, 0, 1, 1, 1], [0], [0]>} : vector<8x8x8xf32>, vector<8x8x8xf32>, vector<8x8x8xf32> -> vector<8x8x8xf32>
    "tpu.trace_stop"() : () -> ()
    %cst_11 = arith.constant dense<0xFF800000> : vector<8x8xf32>
    %53 = vector.multi_reduction <maximumf>, %52, %cst_11 [2] : vector<8x8x8xf32> to vector<8x8xf32>
    %54 = vector.shape_cast %53 : vector<8x8xf32> to vector<8x8x1xf32>
    %55 = vector.broadcast %54 : vector<8x8x1xf32> to vector<8x8x8xf32>
    %56 = arith.subf %52, %55 : vector<8x8x8xf32>
    %57 = math.exp %56 : vector<8x8x8xf32>
    %cst_12 = arith.constant dense<0.000000e+00> : vector<8x8xf32>
    %58 = vector.multi_reduction <add>, %57, %cst_12 [2] : vector<8x8x8xf32> to vector<8x8xf32>
    %59 = vector.shape_cast %58 : vector<8x8xf32> to vector<8x8x1xf32>
    %60 = vector.broadcast %59 : vector<8x8x1xf32> to vector<8x8x8xf32>
    %61 = arith.divf %57, %60 : vector<8x8x8xf32>
    "tpu.trace_start"() <{level = 10 : i32, message = "bqk,bkd->bqd"}> : () -> ()
    %cst_13 = arith.constant dense<0.000000e+00> : vector<8x8x8xf32>
    %62 = tpu.matmul %61, %51, %cst_13 {dimension_numbers = #tpu.dot_dimension_numbers<[2], [1], [1], [2], [0, 0, 0, 1, 1, 2], [0], [0]>} : vector<8x8x8xf32>, vector<8x8x8xf32>, vector<8x8x8xf32> -> vector<8x8x8xf32>
    "tpu.trace_stop"() : () -> ()
    %63 = vector.extract_strided_slice %62 {offsets = [0, 0, 0], sizes = [2, 8, 8], strides = [1, 1, 1]} : vector<8x8x8xf32> to vector<2x8x8xf32>
    %64 = vector.extract_strided_slice %62 {offsets = [2, 0, 0], sizes = [2, 8, 8], strides = [1, 1, 1]} : vector<8x8x8xf32> to vector<2x8x8xf32>
    %65 = vector.extract_strided_slice %62 {offsets = [4, 0, 0], sizes = [2, 8, 8], strides = [1, 1, 1]} : vector<8x8x8xf32> to vector<2x8x8xf32>
    %66 = vector.extract_strided_slice %62 {offsets = [6, 0, 0], sizes = [2, 8, 8], strides = [1, 1, 1]} : vector<8x8x8xf32> to vector<2x8x8xf32>
    %67 = tpu.concatenate %63, %64, %65, %66 in 2 : vector<2x8x8xf32>, vector<2x8x8xf32>, vector<2x8x8xf32>, vector<2x8x8xf32> -> vector<2x8x32xf32>
    %68 = vector.shape_cast %67 : vector<2x8x32xf32> to vector<16x32xf32>
    %c0_14 = arith.constant 0 : index
    %c0_15 = arith.constant 0 : index
    %69 = vector.load %arg4[%c0_14, %c0_15] : memref<32x32xf32, #tpu.memory_space<vmem>>, vector<32x32xf32>
    %cst_16 = arith.constant dense<0.000000e+00> : vector<16x32xf32>
    %70 = tpu.matmul %68, %69, %cst_16 {dimension_numbers = #tpu.dot_dimension_numbers<[1], [0], [0], [1], [0, 0, 1, 1], [], []>} : vector<16x32xf32>, vector<32x32xf32>, vector<16x32xf32> -> vector<16x32xf32>
    %71 = vector.broadcast %5 : vector<1x32xf32> to vector<16x32xf32>
    %72 = arith.addf %70, %71 : vector<16x32xf32>
    %73 = arith.addf %0, %72 : vector<16x32xf32>
    %cst_17 = arith.constant dense<0.000000e+00> : vector<16xf32>
    %74 = vector.multi_reduction <add>, %73, %cst_17 [1] : vector<16x32xf32> to vector<16xf32>
    %75 = vector.shape_cast %74 : vector<16xf32> to vector<16x1xf32>
    %cst_18 = arith.constant 3.200000e+01 : f32
    %76 = vector.broadcast %cst_18 : f32 to vector<16x1xf32>
    %77 = arith.divf %75, %76 : vector<16x1xf32>
    %78 = vector.broadcast %77 : vector<16x1xf32> to vector<16x32xf32>
    %79 = arith.subf %73, %78 : vector<16x32xf32>
    %80 = arith.mulf %79, %79 : vector<16x32xf32>
    %cst_19 = arith.constant dense<0.000000e+00> : vector<16xf32>
    %81 = vector.multi_reduction <add>, %80, %cst_19 [1] : vector<16x32xf32> to vector<16xf32>
    %82 = vector.shape_cast %81 : vector<16xf32> to vector<16x1xf32>
    %cst_20 = arith.constant 3.200000e+01 : f32
    %83 = vector.broadcast %cst_20 : f32 to vector<16x1xf32>
    %84 = arith.divf %82, %83 : vector<16x1xf32>
    %85 = vector.broadcast %77 : vector<16x1xf32> to vector<16x32xf32>
    %86 = arith.subf %73, %85 : vector<16x32xf32>
    %cst_21 = arith.constant 9.99999974E-6 : f32
    %87 = vector.broadcast %cst_21 : f32 to vector<16x1xf32>
    %88 = arith.addf %84, %87 : vector<16x1xf32>
    %89 = math.rsqrt %88 : vector<16x1xf32>
    %90 = vector.broadcast %89 : vector<16x1xf32> to vector<16x32xf32>
    %91 = arith.mulf %86, %90 : vector<16x32xf32>
    %92 = vector.broadcast %6 : vector<1x32xf32> to vector<16x32xf32>
    %93 = arith.mulf %91, %92 : vector<16x32xf32>
    %94 = vector.broadcast %7 : vector<1x32xf32> to vector<16x32xf32>
    %95 = arith.addf %93, %94 : vector<16x32xf32>
    %c0_22 = arith.constant 0 : index
    %c0_23 = arith.constant 0 : index
    %96 = vector.load %arg5[%c0_22, %c0_23] : memref<32x128xf32, #tpu.memory_space<vmem>>, vector<32x128xf32>
    %cst_24 = arith.constant dense<0.000000e+00> : vector<16x128xf32>
    %97 = tpu.matmul %95, %96, %cst_24 {dimension_numbers = #tpu.dot_dimension_numbers<[1], [0], [0], [1], [0, 0, 1, 1], [], []>} : vector<16x32xf32>, vector<32x128xf32>, vector<16x128xf32> -> vector<16x128xf32>
    %98 = vector.broadcast %8 : vector<1x128xf32> to vector<16x128xf32>
    %99 = arith.addf %97, %98 : vector<16x128xf32>
    %cst_25 = arith.constant 5.000000e-01 : f32
    %100 = vector.broadcast %cst_25 : f32 to vector<16x128xf32>
    %101 = arith.mulf %100, %99 : vector<16x128xf32>
    %cst_26 = arith.constant 2.000000e+00 : f32
    %102 = math.sqrt %cst_26 : f32
    %103 = vector.broadcast %102 : f32 to vector<16x128xf32>
    %104 = arith.divf %99, %103 : vector<16x128xf32>
    %105 = math.erf %104 : vector<16x128xf32>
    %cst_27 = arith.constant 1.000000e+00 : f32
    %106 = vector.broadcast %cst_27 : f32 to vector<16x128xf32>
    %107 = arith.addf %106, %105 : vector<16x128xf32>
    %108 = arith.mulf %101, %107 : vector<16x128xf32>
    %c0_28 = arith.constant 0 : index
    %c0_29 = arith.constant 0 : index
    %109 = vector.load %arg6[%c0_28, %c0_29] : memref<128x32xf32, #tpu.memory_space<vmem>>, vector<128x32xf32>
    %cst_30 = arith.constant dense<0.000000e+00> : vector<16x32xf32>
    %110 = tpu.matmul %108, %109, %cst_30 {dimension_numbers = #tpu.dot_dimension_numbers<[1], [0], [0], [1], [0, 0, 1, 1], [], []>} : vector<16x128xf32>, vector<128x32xf32>, vector<16x32xf32> -> vector<16x32xf32>
    %111 = vector.broadcast %9 : vector<1x32xf32> to vector<16x32xf32>
    %112 = arith.addf %110, %111 : vector<16x32xf32>
    %113 = arith.addf %73, %112 : vector<16x32xf32>
    %c0_31 = arith.constant 0 : index
    %c0_32 = arith.constant 0 : index
    %114 = vector.load %arg7[%c0_31, %c0_32] : memref<16x32xf32, #tpu.memory_space<vmem>>, vector<16x32xf32>
    tpu.vector_store %arg7[%c0_31, %c0_32], %113 {strides = array<i32>} : memref<16x32xf32, #tpu.memory_space<vmem>>, vector<16x32xf32>,
    return
  }
  func.func @transform_0(%arg0: i32) -> (i32, i32) {
    %c0_i32 = arith.constant 0 : i32
    %c0_i32_0 = arith.constant 0 : i32
    %c0_i32_1 = arith.constant 0 : i32
    return %c0_i32, %c0_i32_0 : i32, i32
  }
  func.func @transform_1(%arg0: i32) -> (i32, i32) {
    %c0_i32 = arith.constant 0 : i32
    %c0_i32_0 = arith.constant 0 : i32
    %c0_i32_1 = arith.constant 0 : i32
    return %c0_i32, %c0_i32_0 : i32, i32
  }
  func.func @transform_2(%arg0: i32) -> (i32, i32) {
    %c0_i32 = arith.constant 0 : i32
    %c0_i32_0 = arith.constant 0 : i32
    %c0_i32_1 = arith.constant 0 : i32
    return %c0_i32, %c0_i32_0 : i32, i32
  }
  func.func @transform_3(%arg0: i32) -> (i32, i32) {
    %c0_i32 = arith.constant 0 : i32
    %c0_i32_0 = arith.constant 0 : i32
    %c0_i32_1 = arith.constant 0 : i32
    return %c0_i32, %c0_i32_0 : i32, i32
  }
  func.func @transform_4(%arg0: i32) -> (i32, i32) {
    %c0_i32 = arith.constant 0 : i32
    %c0_i32_0 = arith.constant 0 : i32
    %c0_i32_1 = arith.constant 0 : i32
    return %c0_i32, %c0_i32_0 : i32, i32
  }
  func.func @transform_5(%arg0: i32) -> (i32, i32) {
    %c0_i32 = arith.constant 0 : i32
    %c0_i32_0 = arith.constant 0 : i32
    %c0_i32_1 = arith.constant 0 : i32
    return %c0_i32, %c0_i32_0 : i32, i32
  }
  func.func @transform_6(%arg0: i32) -> (i32, i32) {
    %c0_i32 = arith.constant 0 : i32
    %c0_i32_0 = arith.constant 0 : i32
    %c0_i32_1 = arith.constant 0 : i32
    return %c0_i32, %c0_i32_0 : i32, i32
  }
}

</mosaic_0001>

<bundles_post_ra>
// kernel: tpu_custom_call.1
= control target key start
LH: loop header
LB: loop body
LE: loop exit
PB: predicated region body
PF: predicated region fallthrough
CT: control target
= control target key end

     0   :  { %vm27_vm0 = vcmask 261120   ;;  %s2604_s0 = inlined_call_operand.vmem [shape: f32[16,32], index: 0, kind: input, shape index: {}]   ;;  %s2605_s1 = inlined_call_operand.vmem [shape: f32[8,128], index: 1, kind: input, shape index: {}]   ;;  %s2606_s2 = inlined_call_operand.vmem [shape: f32[32,96], index: 2, kind: input, shape index: {}]   ;;  %s2607_s3 = inlined_call_operand.vmem [shape: f32[32,32], index: 3, kind: input, shape index: {}]   ;;  %s2608_s4 = inlined_call_operand.vmem [shape: f32[32,128], index: 4, kind: input, shape index: {}]   ;;  %s2609_s5 = inlined_call_operand.vmem [shape: f32[128,32], index: 5, kind: input, shape index: {}]   ;;  %s2610_s6 = inlined_call_operand.hbm [shape: f32[16,32], index: 6, kind: output, shape index: {}]  }
   0x1   :  { %v2283_v0 = vld [vmem:[%s2604_s0] sm:$0xff]  ;;  %v2288_v1 = vld [vmem:[%s2604_s0 + $0x8] sm:$0xff] }
   0x2   :  { %11 = vsyncpa [#allocation3], 0  ;;  %v28_v2 = vsel %vm27_vm0, %v2283_v0, 0.0  ;;  %v31_v3 = vsel %vm27_vm0, %v2288_v1, 0.0  ;;  %v67_v14 = vld [vmem:[%s2606_s2] sm:$0xff]  ;;  %v68_v15 = vld [vmem:[%s2606_s2 + $0x8] sm:$0xff]  ;;  %v55_v22 = vlaneseq }
   0x3   :  { %29 = vadd.xlane.f32.xlu0 %v28_v2  ;;  %v69_v16 = vld [vmem:[%s2606_s2 + $0x10] sm:$0xff]  ;;  %v2097_v17 = vpack.c.bf16 %v68_v15, %v67_v14  ;;  %v70_v18 = vld [vmem:[%s2606_s2 + $0x18] sm:$0xff]  ;;  %v2316_v29 = vld [vmem:[%s2605_s1] sm:$0xff]  ;;  %v2233_v43 = vmov 0.0   ;;  %vm2234_vm1 = vmmov 0   ;;  %s2235_s1 = smov 120  }
   0x4   :  { %v2101_v19 = vpack.c.bf16 %v70_v18, %v69_v16  ;;  %v2310_v26 = vshrl.u32 %v55_v22, 7  ;;  %1970 = vmatprep.subr.mxu0 %v2233_v43  ;;  %1972 = vmatprep.mubr.msk.f32.mxu0 %vm2234_vm1, %v2233_v43  ;;  %s2236_s9 = smov 112   ;;  %s2237_s10 = smov 104   ;;  %vm172_vm2 = vcmask 64512   ;;  %vm1501_vm3 = vcmask 130048  }
   0x5   :  { %2098 = vmatprep.subr.bf16.mxu1 %v2097_v17  ;;  %s2238_s11 = smov 96   ;;  %s2239_s12 = smov 64   ;;  %vm1504_vm4 = vcmask 195584  }
   0x6   :  { %2100 = vmatpush3.bf16.msra.mxu1 %v2097_v17  ;;  %v57_v28 = vsub.s32 0, %v2310_v26  ;;  %v63_v30 = vsub.s32 1, %v2310_v26  ;;  %v73_v41 = vsub.s32 2, %v2310_v26  ;;  %s2240_s21 = smov 8   ;;  %s2241_s22 = smov 16  }
   0x7   :  { %32 = vadd.xlane.f32.xlu0 %v31_v3  ;;  %2102 = vmatprep.subr.bf16.mxu1 %v2101_v19 }
   0x8   :  { %v58_v31 = vrot.slane %v2316_v29, %v57_v28  ;;  %v64_v34 = vrot.slane %v2316_v29, %v63_v30  ;;  %v74_v42 = vrot.slane %v2316_v29, %v73_v41 }
   0xa   :  { %2104 = vmatpush3.bf16.msra.mxu1 %v2101_v19 }
   0xb   :  { %1960 = vmatprep.subr.mxu1 %v2233_v43 }
  0x90   :  { %v30_v4 = vpop.xlane.xlu0 %29 }
  0x91   :  { %v35_v5 = vmul.f32 0.03125, %v30_v4 }
  0x93   :  { %v37_v6 = vsub.f32 %v2283_v0, %v35_v5 }
  0x94   :  { %v33_v7 = vpop.xlane.xlu0 %32 }
  0x95   :  { %v36_v8 = vmul.f32 0.03125, %v33_v7  ;;  %v39_v9 = vmul.f32 %v37_v6, %v37_v6 }
  0x97   :  { %v38_v10 = vsub.f32 %v2288_v1, %v36_v8  ;;  %v41_v11 = vsel %vm27_vm0, %v39_v9, 0.0 }
  0x98   :  { %42 = vadd.xlane.f32.xlu1 %v41_v11 }
  0x99   :  { %v40_v12 = vmul.f32 %v38_v10, %v38_v10 }
  0x9b   :  { %v44_v13 = vsel %vm27_vm0, %v40_v12, 0.0 }
  0x9c   :  { %45 = vadd.xlane.f32.xlu1 %v44_v13 }
 0x125   :  { %v43_v20 = vpop.xlane.xlu1 %42 }
 0x126   :  { %v47_v21 = vmul.f32 0.03125, %v43_v20 }
 0x128   :  { %v49_v23 = vadd.f32 1e-05, %v47_v21 }
 0x129   :  { %v46_v24 = vpop.xlane.xlu1 %45 }
 0x12a   :  { %2165 = vrsqrt.f32 %v49_v23  ;;  %v48_v25 = vmul.f32 0.03125, %v46_v24 }
 0x12c   :  { %v50_v27 = vadd.f32 1e-05, %v48_v25 }
 0x12e   :  { %2167 = vrsqrt.f32 %v50_v27 }
 0x134   :  { %v2166_v32 = vpop.eup %2165 }
 0x135   :  { %v53_v33 = vmul.f32 %v2166_v32, %v37_v6 }
 0x137   :  { %v59_v35 = vmul.f32 %v58_v31, %v53_v33 }
 0x138   :  { %v2168_v36 = vpop.eup %2167 }
 0x139   :  { %v54_v37 = vmul.f32 %v2168_v36, %v38_v10  ;;  %v65_v38 = vadd.f32 %v64_v34, %v59_v35 }
 0x13b   :  { %v60_v39 = vmul.f32 %v58_v31, %v54_v37  ;;  %1957 = vmatprep.mubr.msk.f32.mxu1 %vm27_vm0, %v65_v38 }
 0x13d   :  { %v66_v40 = vadd.f32 %v64_v34, %v60_v39 }
 0x13f   :  { %1958 = vmatmul.mubr.msk.f32.vlgmr.msra.gmra.mrb[0].mxu1 %vm27_vm0, %v66_v40 }
 0x140   :  { %1962 = vmatprep.mubr.msk.f32.mxu1 %vm2234_vm1, %v2233_v43 }
 0x212   :  { %v1959_v44 = vpop.f32.mrb[0].mxu1 }
 0x213   :  { %v2331_v45 = vadd.f32 %v1959_v44, %v74_v42  ;;  %v147_v46 = vpop.f32.mrb[1].mxu1 }
 0x214   :  { %v2333_v47 = vadd.f32 %v147_v46, %v74_v42 }
 0x215   :  { %160 = vrot.lane.b32.xlu1 %v2331_v45, %s2235_s1 }
 0x216   :  { %158 = vrot.lane.b32.xlu0 %v2333_v47, %s2235_s1 }
 0x219   :  { %162 = vrot.lane.b32.xlu1 %v2333_v47, %s2236_s9 }
 0x21a   :  { %166 = vrot.lane.b32.xlu0 %v2333_v47, %s2237_s10 }
 0x21d   :  { %164 = vrot.lane.b32.xlu1 %v2331_v45, %s2236_s9 }
 0x21e   :  { %170 = vrot.lane.b32.xlu0 %v2333_v47, %s2238_s11 }
 0x221   :  { %168 = vrot.lane.b32.xlu1 %v2331_v45, %s2237_s10 }
 0x225   :  { %247 = vrot.lane.b32.xlu1 %v2331_v45, %s2238_s11 }
 0x287   :  { %v2343_v48 = vpop.permute.xlu1 %160 }
 0x288   :  { %399 = vrot.lane.b32.xlu1 %v2343_v48, %s2238_s11  ;;  %v2346_v49 = vpop.permute.xlu0 %158 }
 0x289   :  { %323 = vrot.lane.b32.xlu0 %v2346_v49, %s2238_s11 }
 0x28b   :  { %v2349_v50 = vpop.permute.xlu1 %162 }
 0x28c   :  { %v2351_v51 = vpop.permute.xlu0 %166 }
 0x28d   :  { %475 = vrot.lane.b32.xlu0 %v2349_v50, %s2238_s11 }
 0x28f   :  { %v2354_v52 = vpop.permute.xlu1 %164 }
 0x290   :  { %551 = vrot.lane.b32.xlu1 %v2354_v52, %s2238_s11  ;;  %v171_v53 = vpop.permute.xlu0 %170 }
 0x291   :  { %627 = vrot.lane.b32.xlu0 %v2351_v51, %s2238_s11  ;;  %1961 = vmatpush3.xpose.msk.msra.mxu1 %vm172_vm2, %v171_v53 }
 0x292   :  { %1965 = vmatprep.subr.mxu1 %v2233_v43 }
 0x293   :  { %v2360_v54 = vpop.permute.xlu1 %168 }
 0x294   :  { %703 = vrot.lane.b32.xlu1 %v2360_v54, %s2238_s11  ;;  %1963 = vmatmul.mubr.msk.f32.vlgmr.msra.gmra.mrb[2].mxu1 %vm172_vm2, %v2333_v47 }
 0x295   :  { %1967 = vmatprep.mubr.msk.f32.mxu1 %vm2234_vm1, %v2233_v43 }
 0x297   :  { %v248_v55 = vpop.permute.xlu1 %247 }
 0x298   :  { %1966 = vmatpush3.xpose.msk.msra.mxu1 %vm172_vm2, %v248_v55 }
 0x299   :  { %1975 = vmatprep.subr.mxu1 %v2233_v43 }
 0x29b   :  { %1968 = vmatmul.mubr.msk.f32.vlgmr.msra.gmra.mrb[4].mxu1 %vm172_vm2, %v2331_v45 }
 0x29c   :  { %1977 = vmatprep.mubr.msk.f32.mxu1 %vm2234_vm1, %v2233_v43 }
 0x2fa   :  { %v400_v56 = vpop.permute.xlu1 %399 }
 0x2fb   :  { %1976 = vmatpush3.xpose.msk.msra.mxu1 %vm172_vm2, %v400_v56  ;;  %v324_v57 = vpop.permute.xlu0 %323 }
 0x2fc   :  { %1971 = vmatpush3.xpose.msk.msra.mxu0 %vm172_vm2, %v324_v57  ;;  %1985 = vmatprep.subr.mxu1 %v2233_v43 }
 0x2fd   :  { %1980 = vmatprep.subr.mxu0 %v2233_v43 }
 0x2fe   :  { %1978 = vmatmul.mubr.msk.f32.vlgmr.msra.gmra.mrb[6].mxu1 %vm172_vm2, %v2343_v48 }
 0x2ff   :  { %1973 = vmatmul.mubr.msk.f32.vlgmr.msra.gmra.mrb[0].mxu0 %vm172_vm2, %v2346_v49  ;;  %v476_v58 = vpop.permute.xlu0 %475  ;;  %1987 = vmatprep.mubr.msk.f32.mxu1 %vm2234_vm1, %v2233_v43 }
 0x300   :  { %1981 = vmatpush3.xpose.msk.msra.mxu0 %vm172_vm2, %v476_v58  ;;  %1982 = vmatprep.mubr.msk.f32.mxu0 %vm2234_vm1, %v2233_v43 }
 0x301   :  { %1990 = vmatprep.subr.mxu0 %v2233_v43 }
 0x302   :  { %v552_v59 = vpop.permute.xlu1 %551 }
 0x303   :  { %1983 = vmatmul.mubr.msk.f32.vlgmr.msra.gmra.mrb[2].mxu0 %vm172_vm2, %v2349_v50  ;;  %1986 = vmatpush3.xpose.msk.msra.mxu1 %vm172_vm2, %v552_v59  ;;  %v628_v60 = vpop.permute.xlu0 %627 }
 0x304   :  { %1991 = vmatpush3.xpose.msk.msra.mxu0 %vm172_vm2, %v628_v60  ;;  %1992 = vmatprep.mubr.msk.f32.mxu0 %vm2234_vm1, %v2233_v43 }
 0x305   :  { %1995 = vmatprep.subr.mxu1 %v2233_v43  ;;  %2000 = vmatprep.subr.mxu0 %v2233_v43 }
 0x306   :  { %v704_v61 = vpop.permute.xlu1 %703  ;;  %1988 = vmatmul.mubr.msk.f32.vlgmr.msra.gmra.mrb[8].mxu1 %vm172_vm2, %v2354_v52 }
 0x307   :  { %1993 = vmatmul.mubr.msk.f32.vlgmr.msra.gmra.mrb[4].mxu0 %vm172_vm2, %v2351_v51  ;;  %1996 = vmatpush3.xpose.msk.msra.mxu1 %vm172_vm2, %v704_v61 }
 0x308   :  { %1997 = vmatprep.mubr.msk.f32.mxu1 %vm2234_vm1, %v2233_v43  ;;  %2005 = vmatprep.subr.mxu1 %v2233_v43 }
 0x309   :  { %2002 = vmatprep.mubr.msk.f32.mxu0 %vm2234_vm1, %v2233_v43 }
 0x30a   :  { %1998 = vmatmul.mubr.msk.f32.vlgmr.msra.gmra.mrb[10].mxu1 %vm172_vm2, %v2360_v54 }
 0x30b   :  { %2007 = vmatprep.mubr.msk.f32.mxu1 %vm2234_vm1, %v2233_v43 }
 0x367   :  { %v243_v62 = vpop.f32.mrb[2].mxu1 }
 0x368   :  { %v1964_v63 = vpop.f32.mrb[3].mxu1  ;;  %v779_v2 = vsel %vm172_vm2, %v243_v62, -inf }
 0x369   :  { %780 = vmax.xlane.f32.xlu0 %v779_v2 }
 0x36e   :  { %v319_v3 = vpop.f32.mrb[4].mxu1 }
 0x36f   :  { %v1969_v4 = vpop.f32.mrb[5].mxu1  ;;  %v782_v5 = vsel %vm172_vm2, %v319_v3, -inf }
 0x370   :  { %783 = vmax.xlane.f32.xlu1 %v782_v5 }
 0x3d1   :  { %v471_v6 = vpop.f32.mrb[6].mxu1 }
 0x3d2   :  { %v395_v7 = vpop.f32.mrb[0].mxu0  ;;  %v1979_v8 = vpop.f32.mrb[7].mxu1  ;;  %v788_v9 = vsel %vm172_vm2, %v471_v6, -inf }
 0x3d3   :  { %789 = vmax.xlane.f32.xlu0 %v788_v9  ;;  %v1974_v10 = vpop.f32.mrb[1].mxu0  ;;  %v785_v12 = vsel %vm172_vm2, %v395_v7, -inf }
 0x3d6   :  { %v547_v11 = vpop.f32.mrb[2].mxu0 }
 0x3d7   :  { %786 = vmax.xlane.f32.xlu0 %v785_v12  ;;  %v1984_v13 = vpop.f32.mrb[3].mxu0  ;;  %v791_v18 = vsel %vm172_vm2, %v547_v11, -inf }
 0x3d9   :  { %v623_v14 = vpop.f32.mrb[8].mxu1 }
 0x3da   :  { %v1989_v15 = vpop.f32.mrb[9].mxu1  ;;  %v699_v16 = vpop.f32.mrb[4].mxu0  ;;  %v794_v17 = vsel %vm172_vm2, %v623_v14, -inf }
 0x3db   :  { %795 = vmax.xlane.f32.xlu1 %v794_v17  ;;  %792 = vmax.xlane.f32.xlu0 %v791_v18  ;;  %v1994_v19 = vpop.f32.mrb[5].mxu0  ;;  %v797_v23 = vsel %vm172_vm2, %v699_v16, -inf }
 0x3dd   :  { %v775_v20 = vpop.f32.mrb[10].mxu1 }
 0x3de   :  { %v1999_v21 = vpop.f32.mrb[11].mxu1  ;;  %v800_v22 = vsel %vm172_vm2, %v775_v20, -inf }
 0x3df   :  { %801 = vmax.xlane.f32.xlu1 %v800_v22  ;;  %798 = vmax.xlane.f32.xlu0 %v797_v23 }
 0x3f0   :  { %943 = vrot.lane.b32.xlu1 %v2331_v45, %s2239_s12 }
 0x3f4   :  { %1019 = vrot.lane.b32.xlu1 %v2346_v49, %s2239_s12 }
 0x3f5   :  { %867 = vrot.lane.b32.xlu0 %v2333_v47, %s2239_s12 }
 0x3f6   :  { %v781_v24 = vpop.xlane.xlu0 %780 }
 0x3f7   :  { %v803_v25 = vsub.f32 %v243_v62, %v781_v24 }
 0x3f8   :  { %1095 = vrot.lane.b32.xlu1 %v2343_v48, %s2239_s12 }
 0x3f9   :  { %1171 = vrot.lane.b32.xlu0 %v2349_v50, %s2239_s12  ;;  %v811_v27 = vmul.f32 1.442695, %v803_v25 }
 0x3fb   :  { %2169 = vpow2.f32 %v811_v27 }
 0x3fc   :  { %1247 = vrot.lane.b32.xlu1 %v2354_v52, %s2239_s12 }
 0x3fd   :  { %v784_v28 = vpop.xlane.xlu1 %783 }
 0x3fe   :  { %v804_v30 = vsub.f32 %v319_v3, %v784_v28 }
 0x400   :  { %v813_v31 = vmul.f32 1.442695, %v804_v30 }
 0x402   :  { %2171 = vpow2.f32 %v813_v31 }
 0x405   :  { %v2429_v32 = vpop.eup %2169 }
 0x406   :  { %v827_v33 = vsel %vm172_vm2, %v2429_v32, 0.0 }
 0x40c   :  { %v2433_v34 = vpop.eup %2171 }
 0x40d   :  { %v830_v35 = vsel %vm172_vm2, %v2433_v34, 0.0 }
 0x418   :  { %828 = vadd.xlane.f32.xlu0 %v827_v33 }
 0x420   :  { %831 = vadd.xlane.f32.xlu1 %v830_v35 }
 0x460   :  { %v790_v36 = vpop.xlane.xlu0 %789 }
 0x461   :  { %v806_v37 = vsub.f32 %v471_v6, %v790_v36 }
 0x463   :  { %v817_v38 = vmul.f32 1.442695, %v806_v37 }
 0x464   :  { %v787_v39 = vpop.xlane.xlu0 %786 }
 0x465   :  { %2173 = vpow2.f32 %v817_v38  ;;  %v805_v40 = vsub.f32 %v395_v7, %v787_v39 }
 0x467   :  { %v815_v41 = vmul.f32 1.442695, %v805_v40 }
 0x468   :  { %v796_v42 = vpop.xlane.xlu1 %795  ;;  %v793_v44 = vpop.xlane.xlu0 %792 }
 0x469   :  { %2175 = vpow2.f32 %v815_v41  ;;  %v808_v45 = vsub.f32 %v623_v14, %v796_v42  ;;  %v807_v46 = vsub.f32 %v547_v11, %v793_v44  ;;  %v1507_v44 = vld [vmem:[%s2607_s3] sm:$0xff] }
 0x46b   :  { %v821_v47 = vmul.f32 1.442695, %v808_v45  ;;  %v819_v48 = vmul.f32 1.442695, %v807_v46  ;;  %v1508_v45 = vld [vmem:[%s2607_s3 + $0x8] sm:$0xff] }
 0x46c   :  { %v802_v49 = vpop.xlane.xlu1 %801  ;;  %v799_v50 = vpop.xlane.xlu0 %798  ;;  %v2105_v46 = vpack.c.bf16 %v1508_v45, %v1507_v44  ;;  %v1740_v44 = vld [vmem:[%s2609_s5 + $0x20] sm:$0xff]  ;;  %v1741_v45 = vld [vmem:[%s2609_s5 + $0x28] sm:$0xff] }
 0x46d   :  { %2177 = vpow2.f32 %v821_v47  ;;  %v810_v52 = vsub.f32 %v775_v20, %v802_v49  ;;  %v809_v53 = vsub.f32 %v699_v16, %v799_v50  ;;  %v1510_v47 = vld [vmem:[%s2607_s3 + $0x18] sm:$0xff] }
 0x46e   :  { %2179 = vpow2.f32 %v819_v48 }
 0x46f   :  { %v2174_v55 = vpop.eup %2173  ;;  %v825_v56 = vmul.f32 1.442695, %v810_v52  ;;  %v823_v57 = vmul.f32 1.442695, %v809_v53 }
 0x470   :  { %v944_v58 = vpop.permute.xlu1 %943  ;;  %v868_v59 = vpop.permute.xlu0 %867  ;;  %v836_v60 = vsel %vm172_vm2, %v2174_v55, 0.0 }
 0x471   :  { %2181 = vpow2.f32 %v825_v56  ;;  %2006 = vmatpush3.msra.mxu1 %v944_v58  ;;  %837 = vadd.xlane.f32.xlu1 %v836_v60 }
 0x472   :  { %2183 = vpow2.f32 %v823_v57  ;;  %2001 = vmatpush3.msra.mxu0 %v868_v59  ;;  %2015 = vmatprep.subr.mxu1 %v2233_v43 }
 0x473   :  { %v2176_v61 = vpop.eup %2175  ;;  %2010 = vmatprep.subr.mxu0 %v2233_v43 }
 0x474   :  { %v833_v62 = vsel %vm172_vm2, %v2176_v61, 0.0  ;;  %v1020_v9 = vpop.permute.xlu1 %1019  ;;  %v1172_v10 = vpop.permute.xlu0 %1171 }
 0x475   :  { %834 = vadd.xlane.f32.xlu0 %v833_v62 }
 0x477   :  { %v2178_v63 = vpop.eup %2177 }
 0x478   :  { %v2180_v2 = vpop.eup %2179  ;;  %v842_v3 = vsel %vm172_vm2, %v2178_v63, 0.0  ;;  %v1096_v11 = vpop.permute.xlu1 %1095 }
 0x479   :  { %843 = vadd.xlane.f32.xlu1 %v842_v3  ;;  %v839_v4 = vsel %vm172_vm2, %v2180_v2, 0.0 }
 0x47a   :  { %840 = vadd.xlane.f32.xlu0 %v839_v4 }
 0x47b   :  { %v2443_v5 = vpop.eup %2181 }
 0x47c   :  { %v2445_v6 = vpop.eup %2183  ;;  %v848_v7 = vsel %vm172_vm2, %v2443_v5, 0.0  ;;  %v1248_v13 = vpop.permute.xlu1 %1247 }
 0x47d   :  { %849 = vadd.xlane.f32.xlu1 %v848_v7  ;;  %v845_v8 = vsel %vm172_vm2, %v2445_v6, 0.0 }
 0x47e   :  { %846 = vadd.xlane.f32.xlu0 %v845_v8 }
 0x48e   :  { %1399 = vrot.lane.b32.xlu1 %v2360_v54, %s2239_s12 }
 0x494   :  { %1323 = vrot.lane.b32.xlu0 %v2351_v51, %s2239_s12 }
 0x4a5   :  { %v829_v12 = vpop.xlane.xlu0 %828 }
 0x4a6   :  { %2185 = vrcp.f32 %v829_v12 }
 0x4ad   :  { %v832_v14 = vpop.xlane.xlu1 %831 }
 0x4ae   :  { %2187 = vrcp.f32 %v832_v14 }
 0x4b0   :  { %v2186_v15 = vpop.eup %2185 }
 0x4b1   :  { %v852_v16 = vmul.f32 %v2186_v15, %v2429_v32 }
 0x4b3   :  { %2003 = vmatmul.mubr.msk.f32.vlgmr.msra.gmra.mrb[6].mxu0 %vm172_vm2, %v852_v16 }
 0x4b4   :  { %2011 = vmatpush3.msra.mxu0 %v1020_v9  ;;  %2012 = vmatprep.mubr.msk.f32.mxu0 %vm2234_vm1, %v2233_v43 }
 0x4b5   :  { %2020 = vmatprep.subr.mxu0 %v2233_v43 }
 0x4b8   :  { %v2188_v51 = vpop.eup %2187 }
 0x4b9   :  { %v854_v54 = vmul.f32 %v2188_v51, %v2433_v34 }
 0x4bb   :  { %2008 = vmatmul.mubr.msk.f32.vlgmr.msra.gmra.mrb[12].mxu1 %vm172_vm2, %v854_v54 }
 0x4bc   :  { %2016 = vmatpush3.msra.mxu1 %v1096_v11  ;;  %2017 = vmatprep.mubr.msk.f32.mxu1 %vm2234_vm1, %v2233_v43 }
 0x4bd   :  { %2025 = vmatprep.subr.mxu1 %v2233_v43 }
 0x4fe   :  { %v838_v17 = vpop.xlane.xlu1 %837 }
 0x4ff   :  { %2189 = vrcp.f32 %v838_v17 }
 0x502   :  { %v835_v18 = vpop.xlane.xlu0 %834 }
 0x503   :  { %2191 = vrcp.f32 %v835_v18 }
 0x506   :  { %v844_v19 = vpop.xlane.xlu1 %843 }
 0x507   :  { %2193 = vrcp.f32 %v844_v19  ;;  %v841_v20 = vpop.xlane.xlu0 %840 }
 0x508   :  { %2195 = vrcp.f32 %v841_v20 }
 0x509   :  { %v2190_v21 = vpop.eup %2189 }
 0x50a   :  { %v858_v22 = vmul.f32 %v2190_v21, %v2174_v55  ;;  %v850_v23 = vpop.xlane.xlu1 %849 }
 0x50b   :  { %2197 = vrcp.f32 %v850_v23  ;;  %v847_v24 = vpop.xlane.xlu0 %846 }
 0x50c   :  { %2199 = vrcp.f32 %v847_v24  ;;  %2018 = vmatmul.mubr.msk.f32.vlgmr.msra.gmra.mrb[14].mxu1 %vm172_vm2, %v858_v22 }
 0x50d   :  { %v2192_v25 = vpop.eup %2191  ;;  %2026 = vmatpush3.msra.mxu1 %v1248_v13  ;;  %2027 = vmatprep.mubr.msk.f32.mxu1 %vm2234_vm1, %v2233_v43  ;;  %v1513_v13 = vsub.s32 3, %v2310_v26 }
 0x50e   :  { %v856_v27 = vmul.f32 %v2192_v25, %v2176_v61  ;;  %2035 = vmatprep.subr.mxu1 %v2233_v43  ;;  %v1400_v33 = vpop.permute.xlu1 %1399 }
 0x50f   :  { %v1324_v35 = vpop.permute.xlu0 %1323  ;;  %v1514_v14 = vrot.slane %v2316_v29, %v1513_v13  ;;  %v1748_v13 = vld [vmem:[%s2609_s5 + $0x60] sm:$0xff] }
 0x510   :  { %2013 = vmatmul.mubr.msk.f32.vlgmr.msra.gmra.mrb[8].mxu0 %vm172_vm2, %v856_v27 }
 0x511   :  { %v2194_v28 = vpop.eup %2193  ;;  %2021 = vmatpush3.msra.mxu0 %v1172_v10  ;;  %2022 = vmatprep.mubr.msk.f32.mxu0 %vm2234_vm1, %v2233_v43 }
 0x512   :  { %v2196_v30 = vpop.eup %2195  ;;  %v862_v31 = vmul.f32 %v2194_v28, %v2178_v63  ;;  %2030 = vmatprep.subr.mxu0 %v2233_v43 }
 0x513   :  { %v860_v32 = vmul.f32 %v2196_v30, %v2180_v2 }
 0x514   :  { %2028 = vmatmul.mubr.msk.f32.vlgmr.msra.gmra.mrb[16].mxu1 %vm172_vm2, %v862_v31  ;;  %v1636_v31 = vld [vmem:[%s2608_s4] sm:$0xff] }
 0x515   :  { %v2198_v34 = vpop.eup %2197  ;;  %2023 = vmatmul.mubr.msk.f32.vlgmr.msra.gmra.mrb[10].mxu0 %vm172_vm2, %v860_v32  ;;  %2036 = vmatpush3.msra.mxu1 %v1400_v33  ;;  %v1637_v32 = vld [vmem:[%s2608_s4 + $0x8] sm:$0xff] }
 0x516   :  { %v2200_v36 = vpop.eup %2199  ;;  %v866_v37 = vmul.f32 %v2198_v34, %v2443_v5  ;;  %2031 = vmatpush3.msra.mxu0 %v1324_v35  ;;  %2032 = vmatprep.mubr.msk.f32.mxu0 %vm2234_vm1, %v2233_v43  ;;  %v2113_v33 = vpack.c.bf16 %v1637_v32, %v1636_v31  ;;  %v1638_v34 = vld [vmem:[%s2608_s4 + $0x10] sm:$0xff]  ;;  %v1639_v35 = vld [vmem:[%s2608_s4 + $0x18] sm:$0xff] }
 0x517   :  { %v864_v38 = vmul.f32 %v2200_v36, %v2445_v6  ;;  %2037 = vmatprep.mubr.msk.f32.mxu1 %vm2234_vm1, %v2233_v43  ;;  %2106 = vmatprep.subr.bf16.mxu1 %v2105_v46  ;;  %v1509_v43 = vld [vmem:[%s2607_s3 + $0x10] sm:$0xff]  ;;  %s2242_s3 = smov 24   ;;  %v2117_v36 = vpack.c.bf16 %v1639_v35, %v1638_v34  ;;  %v1754_v35 = vsub.s32 7, %v2310_v26 }
 0x518   :  { %2038 = vmatmul.mubr.msk.f32.vlgmr.msra.gmra.mrb[18].mxu1 %vm172_vm2, %v866_v37  ;;  %v2109_v48 = vpack.c.bf16 %v1510_v47, %v1509_v43  ;;  %v1736_v37 = vld [vmem:[%s2609_s5] sm:$0xff] }
 0x519   :  { %2033 = vmatmul.mubr.msk.f32.vlgmr.msra.gmra.mrb[12].mxu0 %vm172_vm2, %v864_v38  ;;  %2108 = vmatpush3.bf16.msra.mxu1 %v2105_v46  ;;  %v1737_v38 = vld [vmem:[%s2609_s5 + $0x8] sm:$0xff]  ;;  %v2129_v46 = vpack.c.bf16 %v1741_v45, %v1740_v44 }
 0x51a   :  { %2110 = vmatprep.subr.bf16.mxu1 %v2109_v48 }
 0x51d   :  { %2112 = vmatpush3.bf16.msra.mxu1 %v2109_v48 }
 0x51e   :  { %2114 = vmatprep.subr.bf16.mxu1 %v2113_v33 }
 0x586   :  { %v939_v39 = vpop.f32.mrb[6].mxu0 }
 0x587   :  { %v2004_v40 = vpop.f32.mrb[7].mxu0 }
 0x588   :  { %v2121_v40 = vpack.c.bf16 %v1737_v38, %v1736_v37 }
 0x58a   :  { %2122 = vmatprep.subr.bf16.mxu0 %v2121_v40 }
 0x58b   :  { %2124 = vmatpush3.bf16.msra.mxu0 %v2121_v40 }
 0x58e   :  { %v1015_v41 = vpop.f32.mrb[12].mxu1 }
 0x58f   :  { %v2009_v42 = vpop.f32.mrb[13].mxu1 }
 0x5df   :  { %v1167_v49 = vpop.f32.mrb[14].mxu1 }
 0x5e0   :  { %1479 = vrot.lane.b32.xlu1 %v1167_v49, %s2240_s21  ;;  %v2019_v50 = vpop.f32.mrb[15].mxu1 }
 0x5e3   :  { %v1091_v52 = vpop.f32.mrb[8].mxu0 }
 0x5e4   :  { %1477 = vrot.lane.b32.xlu0 %v1091_v52, %s2240_s21  ;;  %v2014_v53 = vpop.f32.mrb[9].mxu0 }
 0x5e5   :  { %v1626_v53 = vsub.s32 4, %v2310_v26 }
 0x5e7   :  { %v1319_v55 = vpop.f32.mrb[16].mxu1 }
 0x5e8   :  { %v1243_v56 = vpop.f32.mrb[10].mxu0  ;;  %1487 = vrot.lane.b32.xlu1 %v1319_v55, %s2241_s22  ;;  %v2029_v57 = vpop.f32.mrb[17].mxu1  ;;  %v1632_v55 = vsub.s32 5, %v2310_v26 }
 0x5e9   :  { %1485 = vrot.lane.b32.xlu0 %v1243_v56, %s2241_s22  ;;  %v2024_v58 = vpop.f32.mrb[11].mxu0  ;;  %v1627_v56 = vrot.slane %v2316_v29, %v1626_v53 }
 0x5eb   :  { %v1471_v59 = vpop.f32.mrb[18].mxu1 }
 0x5ec   :  { %v1395_v60 = vpop.f32.mrb[12].mxu0  ;;  %1495 = vrot.lane.b32.xlu1 %v1471_v59, %s2242_s3  ;;  %v2039_v61 = vpop.f32.mrb[19].mxu1  ;;  %v1633_v59 = vrot.slane %v2316_v29, %v1632_v55 }
 0x5ed   :  { %1493 = vrot.lane.b32.xlu0 %v1395_v60, %s2242_s3  ;;  %v2034_v62 = vpop.f32.mrb[13].mxu0 }
 0x652   :  { %v1480_v63 = vpop.permute.xlu1 %1479 }
 0x653   :  { %v1500_v5 = vsel %vm172_vm2, %v1015_v41, %v1480_v63  ;;  %v1739_v41 = vld [vmem:[%s2609_s5 + $0x18] sm:$0xff] }
 0x656   :  { %v1478_v2 = vpop.permute.xlu0 %1477 }
 0x657   :  { %v1499_v6 = vsel %vm172_vm2, %v939_v39, %v1478_v2  ;;  %v1738_v39 = vld [vmem:[%s2609_s5 + $0x10] sm:$0xff] }
 0x658   :  { %v2125_v42 = vpack.c.bf16 %v1739_v41, %v1738_v39 }
 0x65a   :  { %v1488_v3 = vpop.permute.xlu1 %1487  ;;  %2126 = vmatprep.subr.bf16.mxu0 %v2125_v42 }
 0x65b   :  { %v1486_v4 = vpop.permute.xlu0 %1485  ;;  %v1503_v7 = vsel %vm1501_vm3, %v1500_v5, %v1488_v3  ;;  %2128 = vmatpush3.bf16.msra.mxu0 %v2125_v42  ;;  %v1743_v5 = vld [vmem:[%s2609_s5 + $0x38] sm:$0xff] }
 0x65c   :  { %v1502_v9 = vsel %vm1501_vm3, %v1499_v6, %v1486_v4  ;;  %2130 = vmatprep.subr.bf16.mxu0 %v2129_v46  ;;  %v1742_v4 = vld [vmem:[%s2609_s5 + $0x30] sm:$0xff] }
 0x65d   :  { %v2133_v6 = vpack.c.bf16 %v1743_v5, %v1742_v4 }
 0x65e   :  { %v1496_v8 = vpop.permute.xlu1 %1495 }
 0x65f   :  { %v1506_v10 = vsel %vm1504_vm4, %v1503_v7, %v1496_v8  ;;  %v1494_v11 = vpop.permute.xlu0 %1493  ;;  %2132 = vmatpush3.bf16.msra.mxu0 %v2129_v46  ;;  %v1744_v7 = vld [vmem:[%s2609_s5 + $0x40] sm:$0xff]  ;;  %v1745_v8 = vld [vmem:[%s2609_s5 + $0x48] sm:$0xff] }
 0x660   :  { %v1505_v12 = vsel %vm1504_vm4, %v1502_v9, %v1494_v11  ;;  %2134 = vmatprep.subr.bf16.mxu0 %v2133_v6  ;;  %v2137_v9 = vpack.c.bf16 %v1745_v8, %v1744_v7  ;;  %v1747_v11 = vld [vmem:[%s2609_s5 + $0x58] sm:$0xff] }
 0x661   :  { %2048 = vmatprep.mubr.msk.f32.mxu1 %vm27_vm0, %v1505_v12 }
 0x662   :  { %2049 = vmatmul.mubr.msk.f32.vlgmr.msra.gmra.mrb[20].mxu1 %vm27_vm0, %v1506_v10  ;;  %v1746_v10 = vld [vmem:[%s2609_s5 + $0x50] sm:$0xff] }
 0x663   :  { %2116 = vmatpush3.bf16.msra.mxu1 %v2113_v33  ;;  %2136 = vmatpush3.bf16.msra.mxu0 %v2133_v6  ;;  %v2141_v12 = vpack.c.bf16 %v1747_v11, %v1746_v10 }
 0x664   :  { %2118 = vmatprep.subr.bf16.mxu1 %v2117_v36  ;;  %2138 = vmatprep.subr.bf16.mxu0 %v2137_v9 }
 0x667   :  { %2120 = vmatpush3.bf16.msra.mxu1 %v2117_v36  ;;  %2140 = vmatpush3.bf16.msra.mxu0 %v2137_v9  ;;  %v1755_v36 = vrot.slane %v2316_v29, %v1754_v35 }
 0x668   :  { %2142 = vmatprep.subr.bf16.mxu0 %v2141_v12 }
 0x66b   :  { %2144 = vmatpush3.bf16.msra.mxu0 %v2141_v12 }
 0x735   :  { %v2050_v15 = vpop.f32.mrb[20].mxu1 }
 0x736   :  { %v1593_v16 = vadd.f32 %v2050_v15, %v1514_v14  ;;  %v1587_v51 = vpop.f32.mrb[21].mxu1 }
 0x737   :  { %v1588_v54 = vadd.f32 %v1587_v51, %v1514_v14  ;;  %v1749_v14 = vld [vmem:[%s2609_s5 + $0x68] sm:$0xff]  ;;  %v1751_v51 = vld [vmem:[%s2609_s5 + $0x78] sm:$0xff] }
 0x738   :  { %v2504_v17 = vadd.f32 %v1593_v16, %v2288_v1  ;;  %v2145_v15 = vpack.c.bf16 %v1749_v14, %v1748_v13  ;;  %v1750_v16 = vld [vmem:[%s2609_s5 + $0x70] sm:$0xff]  ;;  %s2243_s5 = smov [#allocation2]  }
 0x739   :  { %v2507_v18 = vadd.f32 %v1588_v54, %v2283_v0  ;;  %v2149_v54 = vpack.c.bf16 %v1751_v51, %v1750_v16  ;;  %s1840_s1 = sshll.u32 %s2243_s5, 4  ;;  %s1841_s1 = int_to_ptr.vmem [resolvable:$true] %s1840_s1 }
 0x73a   :  { %v1601_v19 = vsel %vm27_vm0, %v2504_v17, 0.0  ;;  %2146 = vmatprep.subr.bf16.mxu0 %v2145_v15  ;;  %s2209_s9 = scalar_lea.vmem %s1841_s1, 256  ;;  %p2214_p1 = scmp.lt.s32.totalorder %s1841_s1, %s1841_s1 }
 0x73b   :  { %1602 = vadd.xlane.f32.xlu1 %v1601_v19  ;;  %v1598_v20 = vsel %vm27_vm0, %v2507_v18, 0.0  ;;  %2148 = vmatpush3.bf16.msra.mxu0 %v2145_v15  ;;  %v1642_v19 = vsub.s32 6, %v2310_v26  ;;  %p2210_p0 = scmp.ne.s32.totalorder %s1841_s1, %s2209_s9  ;;  %p2215_p2 = scmp.lt.s32.totalorder %s2209_s9, %s2209_s9 }
 0x73c   :  { %1599 = vadd.xlane.f32.xlu0 %v1598_v20  ;;  %2150 = vmatprep.subr.bf16.mxu0 %v2149_v54 }
 0x73d   :  { %v1643_v20 = vrot.slane %v2316_v29, %v1642_v19  ;;  %p2216_p3 = por %p2215_p2, %p2214_p1 }
 0x73f   :  { %2152 = vmatpush3.bf16.msra.mxu0 %v2149_v54  ;;  %p2217_p4 = pnand %p2216_p3, %p2210_p0 }
 0x7c8   :  { %v1603_v21 = vpop.xlane.xlu1 %1602 }
 0x7c9   :  { %v1605_v22 = vmul.f32 0.03125, %v1603_v21  ;;  %v1600_v23 = vpop.xlane.xlu0 %1599 }
 0x7ca   :  { %v1604_v24 = vmul.f32 0.03125, %v1600_v23 }
 0x7cb   :  { %v1607_v25 = vsub.f32 %v2504_v17, %v1605_v22 }
 0x7cc   :  { %v1606_v1 = vsub.f32 %v2507_v18, %v1604_v24 }
 0x7cd   :  { %v1609_v28 = vmul.f32 %v1607_v25, %v1607_v25 }
 0x7ce   :  { %v1608_v27 = vmul.f32 %v1606_v1, %v1606_v1 }
 0x7cf   :  { %v1613_v30 = vsel %vm27_vm0, %v1609_v28, 0.0 }
 0x7d0   :  { %v1610_v0 = vsel %vm27_vm0, %v1608_v27, 0.0 }
 0x7d1   :  { %1611 = vadd.xlane.f32.xlu0 %v1610_v0 }
 0x7d5   :  { %1614 = vadd.xlane.f32.xlu0 %v1613_v30 }
 0x85e   :  { %v1612_v43 = vpop.xlane.xlu0 %1611 }
 0x85f   :  { %v1616_v47 = vmul.f32 0.03125, %v1612_v43 }
 0x861   :  { %v1618_v48 = vadd.f32 1e-05, %v1616_v47 }
 0x862   :  { %v1615_v49 = vpop.xlane.xlu0 %1614 }
 0x863   :  { %2201 = vrsqrt.f32 %v1618_v48  ;;  %v1617_v50 = vmul.f32 0.03125, %v1615_v49 }
 0x865   :  { %v1619_v52 = vadd.f32 1e-05, %v1617_v50 }
 0x867   :  { %2203 = vrsqrt.f32 %v1619_v52 }
 0x86d   :  { %v2202_v57 = vpop.eup %2201 }
 0x86e   :  { %v1622_v58 = vmul.f32 %v2202_v57, %v1606_v1 }
 0x870   :  { %v1628_v60 = vmul.f32 %v1627_v56, %v1622_v58 }
 0x871   :  { %v2204_v61 = vpop.eup %2203 }
 0x872   :  { %v1623_v62 = vmul.f32 %v2204_v61, %v1607_v25  ;;  %v1634_v63 = vadd.f32 %v1633_v59, %v1628_v60 }
 0x874   :  { %v1629_v2 = vmul.f32 %v1627_v56, %v1623_v62  ;;  %2059 = vmatprep.mubr.msk.f32.mxu1 %vm27_vm0, %v1634_v63 }
 0x876   :  { %v1635_v3 = vadd.f32 %v1633_v59, %v1629_v2 }
 0x878   :  { %2060 = vmatmul.mubr.msk.f32.vlgmr.msra.gmra.mrb[22].mxu1 %vm27_vm0, %v1635_v3 }
 0x94b   :  { %v2061_v21 = vpop.f32.mrb[22].mxu1 }
 0x94c   :  { %v1722_v22 = vadd.f32 %v2061_v21, %v1643_v20  ;;  %v1716_v23 = vpop.f32.mrb[23].mxu1 }
 0x94d   :  { %v1717_v24 = vadd.f32 %v1716_v23, %v1643_v20 }
 0x94e   :  { %v1729_v25 = vmul.f32 0.70710677, %v1722_v22  ;;  %v1726_v32 = vmul.f32 0.5, %v1722_v22 }
 0x94f   :  { %v1728_v1 = vmul.f32 0.70710677, %v1717_v24  ;;  %v1725_v30 = vmul.f32 0.5, %v1717_v24 }
 0x950   :  { %2205 = verf.f32 %v1729_v25 }
 0x951   :  { %2207 = verf.f32 %v1728_v1 }
 0x95a   :  { %v2206_v27 = vpop.eup %2205 }
 0x95b   :  { %v2208_v0 = vpop.eup %2207  ;;  %v1733_v28 = vadd.f32 1.0, %v2206_v27 }
 0x95c   :  { %v1732_v31 = vadd.f32 1.0, %v2208_v0 }
 0x95d   :  { %v1735_v34 = vmul.f32 %v1733_v28, %v1726_v32 }
 0x95e   :  { %v1734_v33 = vmul.f32 %v1732_v31, %v1725_v30 }
 0x960   :  { %2094 = vmatprep.mubr.f32.mxu0 %v1734_v33 }
 0x961   :  { %2095 = vmatmul.mubr.f32.vlgmr.msra.gmra.mrb[14].mxu0 %v1735_v34 }
 0xa34   :  { %v2096_v37 = vpop.f32.mrb[14].mxu0 }
 0xa35   :  { %v1828_v38 = vadd.f32 %v2096_v37, %v1755_v36  ;;  %v1822_v39 = vpop.f32.mrb[15].mxu0 }
 0xa36   :  { %v1823_v40 = vadd.f32 %v1822_v39, %v1755_v36 }
 0xa37   :  { %v1832_v41 = vadd.f32 %v1828_v38, %v2504_v17 }
 0xa38   :  { %v1831_v42 = vadd.f32 %v1823_v40, %v2507_v18 }
 0xa39   :  { %1834 = vst.msk [vmem:[#allocation2 + $0x8] sm:$0xff] %vm27_vm0, %v1832_v41 }
 0xa3a   :  { %1833 = vst.msk [vmem:[#allocation2] sm:$0xff] %vm27_vm0, %v1831_v42 }
 0xa3b   :  { %2220 = shalt.err (!%p2217_p4)
}
 0xa3c   :  { %s2221_s4 = scalar_lea.hbm %s2610_s6, 256 }
 0xa3d   :  { %p2222_p5 = scmp.ne.s32.totalorder %s2610_s6, %s2221_s4  ;;  %p2225_p6 = scmp.lt.u32.totalorder %s2221_s4, %s2610_s6 }
 0xa3f   :  { %p2227_p7 = pnand %p2225_p6, %p2222_p5 }
 0xa41   :  { %2230 = shalt.err (!%p2227_p7)
}
 0xa42   :  { %s2244_s16 = smov 128  }
 0xa43   :  { %1846 = dma.vmem_to_hbm [thread:$0]  %s1841_s1, 256, %s2610_s6, [#allocation3], %s2244_s16, %s2244_s16, %s2240_s21  }
 0xa44   :  { %2231 = dma.done.wait [#allocation3], 256  }
 0xa45   :  { %2232 = vsyncadd [#allocation3], 4294967040 }
 0xa46   :  { %1850 = vsyncpa [#allocation3], 1 }

</bundles_post_ra>
